<compile_context>
chip_gen: v7x
topology: tpu7x:2x2x1
jax: 0.10.0
libtpu: 0.0.40
codegen_flags: <defaults>
</compile_context>

<pallas_src>
import functools

import jax
import jax.numpy as jnp
from jax.experimental import pallas as pl
from jax.experimental.pallas import tpu as pltpu


def _round_up(x, m):
    return ((x + m - 1) // m) * m


def prior_factor_encoder_kernel(
    e_ref, wkv_ref, smalls_ref, wout_ref, out_ref,
    *, nheads, attention_dim, value_dim, z_dim):
    H, A, V = nheads, attention_dim, value_dim
    ka_w = H * A                     # lane width of the k block
    kv_w = ka_w + H * V              # lane width of the fused k|v activation
    out_w = out_ref.shape[-1]

    # ---- fused K|V projection: bf16 MXU operands, f32 accumulation ----------
    e_b = e_ref[...].astype(jnp.bfloat16)                                 # (B, E)
    kv = jnp.dot(e_b, wkv_ref[...], preferred_element_type=jnp.float32)   # (B, kv_w)
    kv = kv + smalls_ref[0:1, :kv_w]                                      # + fused bias
    B = kv.shape[0]

    # ---- per-head sum / squared-norm of k via indicator matmuls (MXU) -------
    row = jax.lax.broadcasted_iota(jnp.int32, (kv_w, H), 0)
    col = jax.lax.broadcasted_iota(jnp.int32, (kv_w, H), 1)
    ind = jnp.where((row >= col * A) & (row < (col + 1) * A),
                    1.0, 0.0).astype(jnp.float32)                         # (kv_w, H)
    k_sum = jnp.dot(kv, ind, preferred_element_type=jnp.float32)          # (B, H)
    k_sqsum = jnp.dot(kv * kv, ind, preferred_element_type=jnp.float32)   # (B, H)

    # ---- attention scores (q statistics precomputed host-side) --------------
    q_sum = smalls_ref[1:2, :H]        # (1, H)  sum_d q[h, d]
    q_nsq = smalls_ref[2:3, :H]        # (1, H)  ||q[h, :]||^2
    num = jnp.maximum(k_sum * q_sum, 1e-6)                                # (B, H)
    den = jnp.maximum(jnp.sqrt(k_sqsum) * q_nsq, 1e-6)                    # (B, H)
    score = num * pl.reciprocal(den, approx=True)                         # (B, H)

    # ---- h[h, :] = sum_b score[b, h] * v[b, h, :]  — all through the MXU ----
    rrow = jax.lax.broadcasted_iota(jnp.int32, (H, kv_w), 0)
    rcol = jax.lax.broadcasted_iota(jnp.int32, (H, kv_w), 1)
    rep = jnp.where((rcol >= ka_w + rrow * V) & (rcol < ka_w + (rrow + 1) * V),
                    1.0, 0.0).astype(jnp.float32)                         # (H, kv_w)
    score_rep = jnp.dot(score, rep, preferred_element_type=jnp.float32)   # (B, kv_w)
    weighted = score_rep * kv                                             # k lanes -> 0
    h_full = jnp.dot(jnp.ones((1, B), jnp.float32), weighted,
                     preferred_element_type=jnp.float32)                  # (1, kv_w)

    # ---- fused mu|std head: bf16 MXU, lane-dense padded output --------------
    lin = jnp.dot(h_full.astype(jnp.bfloat16), wout_ref[...],
                  preferred_element_type=jnp.float32)
    lin = lin + smalls_ref[3:4, :out_w]                                   # (1, out_w)
    x = jnp.abs(lin)
    softplus_abs = x + jnp.log1p(jnp.exp(-x))     # softplus(|lin|); stable (x >= 0)
    lane = jax.lax.broadcasted_iota(jnp.int32, (1, out_w), 1)
    # lanes [0, z) = mu, lanes [z, 2z) = std; the rest is padding (sliced away).
    out_ref[...] = jnp.where(lane < z_dim, lin, softplus_abs)


def pack_prior_factor_encoder_params(params, *, nheads, attention_dim,
                                     value_dim, z_dim):
    """One-time parameter packing (fused weights/biases + q statistics)."""
    H, A, V, Z = nheads, attention_dim, value_dim, z_dim
    ka_w = H * A
    kv_w = ka_w + H * V
    out_w = max(128, _round_up(2 * Z, 128))
    small_w = max(128, kv_w, out_w)

    # fused K|V weight & bias
    wkv = jnp.concatenate([params["wk"], params["wv"]], axis=1).astype(jnp.bfloat16)
    bkv = jnp.concatenate([params["bk"], params["bv"]], axis=1)            # (1, kv_w)

    # q statistics (parameter-only constants)
    q = params["q"].astype(jnp.float32)
    q_sum = jnp.sum(q, axis=1)[None, :]                                    # (1, H)
    q_nsq = jnp.sum(q * q, axis=1)[None, :]                                # (1, H)

    # fused mu|std bias
    bout = jnp.concatenate([params["bmu"], params["bstd"]], axis=1)        # (1, 2Z)

    def pad_to(v, width):
        return jnp.pad(v, ((0, 0), (0, width - v.shape[1])))

    smalls = jnp.concatenate(
        [pad_to(bkv, small_w), pad_to(q_sum, small_w),
         pad_to(q_nsq, small_w), pad_to(bout, small_w)],
        axis=0).astype(jnp.float32)                                        # (4, small_w)

    # fused mu|std weight, zero-padded to the full k|v lane layout (lane-dense out)
    wout_core = jnp.concatenate([params["wmu"], params["wstd"]], axis=1)   # (H*V, 2Z)
    wout = jnp.zeros((kv_w, out_w), jnp.float32)
    wout = wout.at[ka_w:, :2 * Z].set(wout_core).astype(jnp.bfloat16)      # (kv_w, out_w)

    return {"wkv": wkv, "smalls": smalls, "wout": wout, "out_w": out_w}


def prior_factor_encoder(e, packed, *, nheads, attention_dim, value_dim, z_dim):
    kernel = functools.partial(
        prior_factor_encoder_kernel,
        nheads=nheads, attention_dim=attention_dim,
        value_dim=value_dim, z_dim=z_dim)
    vmem = pl.BlockSpec(memory_space=pltpu.MemorySpace.VMEM)
    out = pl.pallas_call(
        kernel,
        out_shape=jax.ShapeDtypeStruct((1, packed["out_w"]), jnp.float32),
        in_specs=[vmem] * 4,
        out_specs=vmem,
    )(e, packed["wkv"], packed["smalls"], packed["wout"])
    mu = out[:, :z_dim]
    std = out[:, z_dim:2 * z_dim]
    return mu, std


def reference(e, params, nheads):
    """Pure-JAX f32 replica of the PyTorch forward (for correctness check)."""
    B = e.shape[0]
    k = (e @ params["wk"] + params["bk"]).reshape(B, nheads, -1)
    v = (e @ params["wv"] + params["bv"]).reshape(B, nheads, -1)
    q = params["q"]
    num = jnp.maximum(jnp.einsum("abc,bd->ab", k, q), 1e-6)
    norm_k = jnp.linalg.norm(k, axis=2) * jnp.linalg.norm(q, axis=1)
    norm_q = jnp.linalg.norm(q, axis=1)
    den = jnp.maximum(norm_k * norm_q, 1e-6)
    score = num / den
    h_att = jnp.einsum("ab,abc->bc", score, v).reshape(1, -1)
    mu = h_att @ params["wmu"] + params["bmu"]
    std = jax.nn.softplus(jnp.abs(h_att @ params["wstd"] + params["bstd"]))
    return mu, std


def _linear_init(key, fan_in, fan_out):
    kw, kb = jax.random.split(key)
    bound = 1.0 / (fan_in ** 0.5)
    w = jax.random.uniform(kw, (fan_in, fan_out), jnp.float32, -bound, bound)
    b = jax.random.uniform(kb, (1, fan_out), jnp.float32, -bound, bound)
    return w, b


if __name__ == "__main__":
    # small, forward-consistent shapes (H*A + H*V == 128 -> one lane-full vreg)
    batch = 8
    embedding_dim = 32
    attention_dim = 16
    value_dim = 16
    nheads = 4
    z_dim = 8

    key = jax.random.PRNGKey(0)
    k_e, k_k, k_v, k_mu, k_std = jax.random.split(key, 5)

    e = jax.random.normal(k_e, (batch, embedding_dim), jnp.float32)

    wk, bk = _linear_init(k_k, embedding_dim, attention_dim * nheads)
    wv, bv = _linear_init(k_v, embedding_dim, value_dim * nheads)
    wmu, bmu = _linear_init(k_mu, nheads * value_dim, z_dim)
    wstd, bstd = _linear_init(k_std, nheads * value_dim, z_dim)
    q = jnp.ones((nheads, attention_dim), jnp.float32)   # nn.Parameter(torch.ones(...))

    params = dict(wk=wk, bk=bk, wv=wv, bv=bv, q=q,
                  wmu=wmu, bmu=bmu, wstd=wstd, bstd=bstd)

    packed = pack_prior_factor_encoder_params(
        params, nheads=nheads, attention_dim=attention_dim,
        value_dim=value_dim, z_dim=z_dim)

    mu, std = prior_factor_encoder(
        e, packed, nheads=nheads, attention_dim=attention_dim,
        value_dim=value_dim, z_dim=z_dim)
    jax.block_until_ready((mu, std))

    mu_ref, std_ref = reference(e, params, nheads)
    assert mu.shape == (1, z_dim) and std.shape == (1, z_dim)
    # bf16 matmul operands + approx reciprocal -> compare against the f32
    # reference with a tolerance appropriate for bf16 mixed precision.
    assert jnp.allclose(mu, mu_ref, atol=2e-2, rtol=2e-2)
    assert jnp.allclose(std, std_ref, atol=2e-2, rtol=2e-2)
    assert bool(jnp.all(jnp.isfinite(mu))) and bool(jnp.all(jnp.isfinite(std)))

    print("KERNEL_OK")
</pallas_src>

<mosaic_0001>
module attributes {stable_mosaic.version = 11 : i64} {
  func.func @prior_factor_encoder_kernel(%arg0: memref<8x32xf32, #tpu.memory_space<vmem>>, %arg1: memref<32x128xbf16, #tpu.memory_space<vmem>>, %arg2: memref<4x128xf32, #tpu.memory_space<vmem>>, %arg3: memref<128x128xbf16, #tpu.memory_space<vmem>>, %arg4: memref<1x128xf32, #tpu.memory_space<vmem>>) attributes {dimension_semantics = [], scalar_prefetch = 0 : i64, scratch_operands = 0 : i64, tpu.core_type = #tpu.core_type<tc>} {
    %c0 = arith.constant 0 : index
    %c0_0 = arith.constant 0 : index
    %0 = vector.load %arg0[%c0, %c0_0] : memref<8x32xf32, #tpu.memory_space<vmem>>, vector<8x32xf32>
    %1 = arith.truncf %0 : vector<8x32xf32> to vector<8x32xbf16>
    %c0_1 = arith.constant 0 : index
    %c0_2 = arith.constant 0 : index
    %2 = vector.load %arg1[%c0_1, %c0_2] : memref<32x128xbf16, #tpu.memory_space<vmem>>, vector<32x128xbf16>
    %cst = arith.constant dense<0.000000e+00> : vector<8x128xf32>
    %3 = tpu.matmul %1, %2, %cst {dimension_numbers = #tpu.dot_dimension_numbers<[1], [0], [0], [1], [0, 0, 1, 1], [], []>} : vector<8x32xbf16>, vector<32x128xbf16>, vector<8x128xf32> -> vector<8x128xf32>
    %c0_3 = arith.constant 0 : index
    %c0_4 = arith.constant 0 : index
    %4 = vector.load %arg2[%c0_3, %c0_4] : memref<4x128xf32, #tpu.memory_space<vmem>>, vector<1x128xf32>
    %5 = vector.broadcast %4 : vector<1x128xf32> to vector<8x128xf32>
    %6 = arith.addf %3, %5 : vector<8x128xf32>
    %7 = tpu.iota {dimensions = array<i32: 0>} : vector<128x4xi32>
    %8 = tpu.iota {dimensions = array<i32: 1>} : vector<128x4xi32>
    %c16_i32 = arith.constant 16 : i32
    %9 = vector.broadcast %c16_i32 : i32 to vector<128x4xi32>
    %10 = arith.muli %8, %9 : vector<128x4xi32>
    %11 = arith.cmpi sge, %7, %10 : vector<128x4xi32>
    %c1_i32 = arith.constant 1 : i32
    %12 = vector.broadcast %c1_i32 : i32 to vector<128x4xi32>
    %13 = arith.addi %8, %12 : vector<128x4xi32>
    %c16_i32_5 = arith.constant 16 : i32
    %14 = vector.broadcast %c16_i32_5 : i32 to vector<128x4xi32>
    %15 = arith.muli %13, %14 : vector<128x4xi32>
    %16 = arith.cmpi slt, %7, %15 : vector<128x4xi32>
    %17 = arith.andi %11, %16 : vector<128x4xi1>
    %cst_6 = arith.constant 1.000000e+00 : f32
    %cst_7 = arith.constant 0.000000e+00 : f32
    %18 = vector.broadcast %cst_6 : f32 to vector<128x4xf32>
    %19 = vector.broadcast %cst_7 : f32 to vector<128x4xf32>
    %20 = arith.select %17, %18, %19 : vector<128x4xi1>, vector<128x4xf32>
    %cst_8 = arith.constant dense<0.000000e+00> : vector<8x4xf32>
    %21 = tpu.matmul %6, %20, %cst_8 {dimension_numbers = #tpu.dot_dimension_numbers<[1], [0], [0], [1], [0, 0, 1, 1], [], []>} : vector<8x128xf32>, vector<128x4xf32>, vector<8x4xf32> -> vector<8x4xf32>
    %22 = arith.mulf %6, %6 : vector<8x128xf32>
    %cst_9 = arith.constant dense<0.000000e+00> : vector<8x4xf32>
    %23 = tpu.matmul %22, %20, %cst_9 {dimension_numbers = #tpu.dot_dimension_numbers<[1], [0], [0], [1], [0, 0, 1, 1], [], []>} : vector<8x128xf32>, vector<128x4xf32>, vector<8x4xf32> -> vector<8x4xf32>
    %c1 = arith.constant 1 : index
    %c0_10 = arith.constant 0 : index
    %24 = vector.load %arg2[%c1, %c0_10] : memref<4x128xf32, #tpu.memory_space<vmem>>, vector<1x4xf32>
    %c2 = arith.constant 2 : index
    %c0_11 = arith.constant 0 : index
    %25 = vector.load %arg2[%c2, %c0_11] : memref<4x128xf32, #tpu.memory_space<vmem>>, vector<1x4xf32>
    %26 = vector.broadcast %24 : vector<1x4xf32> to vector<8x4xf32>
    %27 = arith.mulf %21, %26 : vector<8x4xf32>
    %cst_12 = arith.constant 9.99999997E-7 : f32
    %28 = vector.broadcast %cst_12 : f32 to vector<8x4xf32>
    %29 = arith.maximumf %27, %28 : vector<8x4xf32>
    %30 = math.sqrt %23 : vector<8x4xf32>
    %31 = vector.broadcast %25 : vector<1x4xf32> to vector<8x4xf32>
    %32 = arith.mulf %30, %31 : vector<8x4xf32>
    %cst_13 = arith.constant 9.99999997E-7 : f32
    %33 = vector.broadcast %cst_13 : f32 to vector<8x4xf32>
    %34 = arith.maximumf %32, %33 : vector<8x4xf32>
    %35 = tpu.reciprocal %34 {approx = true} : vector<8x4xf32> -> vector<8x4xf32>
    %36 = arith.mulf %29, %35 : vector<8x4xf32>
    %37 = tpu.iota {dimensions = array<i32: 0>} : vector<4x128xi32>
    %38 = tpu.iota {dimensions = array<i32: 1>} : vector<4x128xi32>
    %c16_i32_14 = arith.constant 16 : i32
    %39 = vector.broadcast %c16_i32_14 : i32 to vector<4x128xi32>
    %40 = arith.muli %37, %39 : vector<4x128xi32>
    %c64_i32 = arith.constant 64 : i32
    %41 = vector.broadcast %c64_i32 : i32 to vector<4x128xi32>
    %42 = arith.addi %41, %40 : vector<4x128xi32>
    %43 = arith.cmpi sge, %38, %42 : vector<4x128xi32>
    %c1_i32_15 = arith.constant 1 : i32
    %44 = vector.broadcast %c1_i32_15 : i32 to vector<4x128xi32>
    %45 = arith.addi %37, %44 : vector<4x128xi32>
    %c16_i32_16 = arith.constant 16 : i32
    %46 = vector.broadcast %c16_i32_16 : i32 to vector<4x128xi32>
    %47 = arith.muli %45, %46 : vector<4x128xi32>
    %c64_i32_17 = arith.constant 64 : i32
    %48 = vector.broadcast %c64_i32_17 : i32 to vector<4x128xi32>
    %49 = arith.addi %48, %47 : vector<4x128xi32>
    %50 = arith.cmpi slt, %38, %49 : vector<4x128xi32>
    %51 = arith.andi %43, %50 : vector<4x128xi1>
    %cst_18 = arith.constant 1.000000e+00 : f32
    %cst_19 = arith.constant 0.000000e+00 : f32
    %52 = vector.broadcast %cst_18 : f32 to vector<4x128xf32>
    %53 = vector.broadcast %cst_19 : f32 to vector<4x128xf32>
    %54 = arith.select %51, %52, %53 : vector<4x128xi1>, vector<4x128xf32>
    %cst_20 = arith.constant dense<0.000000e+00> : vector<8x128xf32>
    %55 = tpu.matmul %36, %54, %cst_20 {dimension_numbers = #tpu.dot_dimension_numbers<[1], [0], [0], [1], [0, 0, 1, 1], [], []>} : vector<8x4xf32>, vector<4x128xf32>, vector<8x128xf32> -> vector<8x128xf32>
    %56 = arith.mulf %55, %6 : vector<8x128xf32>
    %cst_21 = arith.constant 1.000000e+00 : f32
    %57 = vector.broadcast %cst_21 : f32 to vector<1x8xf32>
    %cst_22 = arith.constant dense<0.000000e+00> : vector<1x128xf32>
    %58 = tpu.matmul %57, %56, %cst_22 {dimension_numbers = #tpu.dot_dimension_numbers<[1], [0], [0], [1], [0, 0, 1, 1], [], []>} : vector<1x8xf32>, vector<8x128xf32>, vector<1x128xf32> -> vector<1x128xf32>
    %59 = arith.truncf %58 : vector<1x128xf32> to vector<1x128xbf16>
    %c0_23 = arith.constant 0 : index
    %c0_24 = arith.constant 0 : index
    %60 = vector.load %arg3[%c0_23, %c0_24] : memref<128x128xbf16, #tpu.memory_space<vmem>>, vector<128x128xbf16>
    %cst_25 = arith.constant dense<0.000000e+00> : vector<1x128xf32>
    %61 = tpu.matmul %59, %60, %cst_25 {dimension_numbers = #tpu.dot_dimension_numbers<[1], [0], [0], [1], [0, 0, 1, 1], [], []>} : vector<1x128xbf16>, vector<128x128xbf16>, vector<1x128xf32> -> vector<1x128xf32>
    %c3 = arith.constant 3 : index
    %c0_26 = arith.constant 0 : index
    %62 = vector.load %arg2[%c3, %c0_26] : memref<4x128xf32, #tpu.memory_space<vmem>>, vector<1x128xf32>
    %63 = arith.addf %61, %62 : vector<1x128xf32>
    %64 = math.absf %63 : vector<1x128xf32>
    %cst_27 = arith.constant 0.000000e+00 : f32
    %65 = vector.broadcast %cst_27 : f32 to vector<1x128xf32>
    %66 = arith.subf %65, %64 : vector<1x128xf32>
    %67 = math.exp %66 : vector<1x128xf32>
    %68 = math.log1p %67 : vector<1x128xf32>
    %69 = arith.addf %64, %68 : vector<1x128xf32>
    %70 = tpu.iota {dimensions = array<i32: 1>} : vector<1x128xi32>
    %c8_i32 = arith.constant 8 : i32
    %71 = vector.broadcast %c8_i32 : i32 to vector<1x128xi32>
    %72 = arith.cmpi slt, %70, %71 : vector<1x128xi32>
    %73 = arith.select %72, %63, %69 : vector<1x128xi1>, vector<1x128xf32>
    %c0_28 = arith.constant 0 : index
    %c0_29 = arith.constant 0 : index
    %74 = vector.load %arg4[%c0_28, %c0_29] : memref<1x128xf32, #tpu.memory_space<vmem>>, vector<1x128xf32>
    tpu.vector_store %arg4[%c0_28, %c0_29], %73 {strides = array<i32>} : memref<1x128xf32, #tpu.memory_space<vmem>>, vector<1x128xf32>,
    return
  }
}

</mosaic_0001>

<bundles_post_ra>
// kernel: tpu_custom_call.1
= control target key start
LH: loop header
LB: loop body
LE: loop exit
PB: predicated region body
PF: predicated region fallthrough
CT: control target
= control target key end

     0   :  { %9 = vsyncpa [#allocation3], 0  ;;  %s1395_s0 = inlined_call_operand.hbm [shape: f32[8,32], index: 0, kind: input, shape index: {}]   ;;  %s1396_s1 = inlined_call_operand.hbm [shape: bf16[32,128], index: 1, kind: input, shape index: {}]   ;;  %s1397_s2 = inlined_call_operand.vmem [shape: f32[4,128], index: 2, kind: input, shape index: {}]   ;;  %s1398_s3 = inlined_call_operand.hbm [shape: bf16[128,128], index: 3, kind: input, shape index: {}]   ;;  %s1399_s4 = inlined_call_operand.hbm [shape: f32[1,128], index: 4, kind: output, shape index: {}]  }
   0x1   :  { %10 = vsyncpa [#allocation6], 0 }
   0x2   :  { %11 = vsyncpa [#allocation4], 0  ;;  %s1054_s15 = smov [#allocation5]   ;;  %s960_s19 = scalar_lea.hbm %s1396_s1, 256 }
   0x3   :  { %s27_s16 = sshll.u32 %s1054_s15, 4  ;;  %p961_p0 = scmp.ne.s32.totalorder %s1396_s1, %s960_s19  ;;  %s28_s16 = int_to_ptr.vmem [resolvable:$true] %s27_s16 }
   0x4   :  { %p964_p1 = scmp.lt.u32.totalorder %s960_s19, %s1396_s1 }
   0x6   :  { %p966_p2 = pnand %p964_p1, %p961_p0 }
   0x8   :  { %969 = shalt.err (!%p966_p2)
}
   0x9   :  { %s970_s24 = scalar_lea.vmem %s28_s16, 256  ;;  %p975_p4 = scmp.lt.s32.totalorder %s28_s16, %s28_s16 }
   0xa   :  { %p971_p3 = scmp.ne.s32.totalorder %s28_s16, %s970_s24  ;;  %p976_p5 = scmp.lt.s32.totalorder %s970_s24, %s970_s24 }
   0xc   :  { %p977_p6 = por %p976_p5, %p975_p4 }
   0xe   :  { %p978_p7 = pnand %p977_p6, %p971_p3 }
  0x10   :  { %981 = shalt.err (!%p978_p7)
}
  0x11   :  { %s1055_s25 = smov 64   ;;  %s1056_s26 = smov 4  }
  0x12   :  { %33 = dma.hbm_to_vmem [thread:$0]  %s1396_s1, 256, %s28_s16, [#allocation6], %s1055_s25, %s1055_s25, %s1056_s26  }
  0x13   :  { %s1057_s29 = smov [#allocation2]   ;;  %s1058_s5 = smov [#allocation7]  }
  0x14   :  { %s18_s30 = sshll.u32 %s1057_s29, 4  ;;  %s41_s6 = sshll.u32 %s1058_s5, 4  ;;  %s19_s30 = int_to_ptr.vmem [resolvable:$true] %s18_s30  ;;  %s42_s6 = int_to_ptr.vmem [resolvable:$true] %s41_s6 }
  0x15   :  { %s982_s9 = scalar_lea.hbm %s1395_s0, 128 }
  0x16   :  { %p983_p8 = scmp.ne.s32.totalorder %s1395_s0, %s982_s9  ;;  %p986_p9 = scmp.lt.u32.totalorder %s982_s9, %s1395_s0 }
  0x18   :  { %p988_p10 = pnand %p986_p9, %p983_p8 }
  0x1a   :  { %991 = shalt.err (!%p988_p10)
}
  0x1b   :  { %s992_s1 = scalar_lea.vmem %s19_s30, 128  ;;  %p997_p12 = scmp.lt.s32.totalorder %s19_s30, %s19_s30 }
  0x1c   :  { %p993_p11 = scmp.ne.s32.totalorder %s19_s30, %s992_s1  ;;  %p998_p13 = scmp.lt.s32.totalorder %s992_s1, %s992_s1 }
  0x1e   :  { %p999_p0 = por %p998_p13, %p997_p12 }
  0x20   :  { %p1000_p1 = pnand %p999_p0, %p993_p11 }
  0x22   :  { %1003 = shalt.err (!%p1000_p1)
}
  0x23   :  { %21 = dma.hbm_to_vmem [thread:$0]  %s1395_s0, 128, %s19_s30, [#allocation3]  }
  0x24   :  { %s1004_s18 = scalar_lea.hbm %s1398_s3, 1024 }
  0x25   :  { %p1005_p2 = scmp.ne.s32.totalorder %s1398_s3, %s1004_s18  ;;  %p1008_p3 = scmp.lt.u32.totalorder %s1004_s18, %s1398_s3 }
  0x27   :  { %p1010_p4 = pnand %p1008_p3, %p1005_p2 }
  0x29   :  { %1013 = shalt.err (!%p1010_p4)
}
  0x2a   :  { %s1014_s23 = scalar_lea.vmem %s42_s6, 1024  ;;  %p1019_p6 = scmp.lt.s32.totalorder %s42_s6, %s42_s6 }
  0x2b   :  { %p1015_p5 = scmp.ne.s32.totalorder %s42_s6, %s1014_s23  ;;  %p1020_p7 = scmp.lt.s32.totalorder %s1014_s23, %s1014_s23 }
  0x2d   :  { %p1021_p8 = por %p1020_p7, %p1019_p6 }
  0x2f   :  { %p1022_p9 = pnand %p1021_p8, %p1015_p5 }
  0x31   :  { %1025 = shalt.err (!%p1022_p9)
}
  0x32   :  { %47 = dma.hbm_to_vmem [thread:$0]  %s1398_s3, 1024, %s42_s6, [#allocation6], %s1055_s25, %s1055_s25, %s1056_s26  }
  0x33   :  { %1048 = dma.done.wait [#allocation3], 128  }
  0x34   :  { %1049 = vsyncadd [#allocation3], 4294967168 }
  0x35   :  { %1050 = dma.done.wait [#allocation6], 1280  }
  0x36   :  { %1051 = vsyncadd [#allocation6], 4294966016  ;;  %v1059_v0 = vmov 0.0   ;;  %vm1060_vm0 = vmmov 0   ;;  %v125_v1 = vlaneseq  ;;  %v1061_v2 = vmov 0.0|0.0   ;;  %v942_v10 = vld [vmem:[#allocation5] sm:$0xff]  }
  0x37   :  { %775 = vmatprep.subr.bf16.mxu1 %v1059_v0  ;;  %779 = vmatprep.mubr.msk.bf16.mxu1 %vm1060_vm0, %v1059_v0  ;;  %v943_v12 = vld [vmem:[#allocation5 + $0x8] sm:$0xff]   ;;  %v58_v13 = vld [vmem:[#allocation2] sm:$0xff]  ;;  %vm81_vm12 = vcmask 261120   ;;  %v1062_v19 = vmov 1.0|1.0  }
  0x38   :  { %907 = vmatprep.subr.bf16.mxu0 %v1061_v2  ;;  %850 = vmatprep.mubr.msk.f32.mxu0 %vm1060_vm0, %v1059_v0  ;;  %v1138_v3 = vshrl.u32 %v125_v1, 7  ;;  %v1140_v4 = vand.u32 127, %v125_v1  ;;  %v59_v18 = vpack.c.bf16 %v58_v13, %v58_v13  ;;  %v676_v40 = vld [vmem:[%s1397_s2] ss:$0 sm:$0xff]  ;;  %v713_v59 = vld [vmem:[%s1397_s2 + $0x2] ss:$0 sm:$0xff] }
  0x39   :  { %776 = vmatpush3.bf16.msra.mxu1 %v942_v10  ;;  %v946_v10 = vld [vmem:[#allocation7 + $0x10] sm:$0xff]   ;;  %v949_v13 = vld [vmem:[#allocation7 + $0x28] sm:$0xff]  }
  0x3a   :  { %v127_v5 = vadd.s32 8, %v1138_v3  ;;  %v1144_v6 = vmul.u32 16, %v1140_v4  ;;  %v161_v7 = vadd.s32 1, %v1140_v4  ;;  %v128_v8 = vadd.s32 16, %v1138_v3  ;;  %777 = vmatprep.subr.bf16.mxu1 %v1059_v0 }
  0x3b   :  { %v129_v9 = vadd.s32 24, %v1138_v3  ;;  %v130_v14 = vadd.s32 32, %v1138_v3  ;;  %v131_v16 = vadd.s32 40, %v1138_v3  ;;  %v132_v21 = vadd.s32 48, %v1138_v3 }
  0x3c   :  { %vm145_vm1 = vcmp.ge.s32.totalorder %v1138_v3, %v1144_v6  ;;  %v1151_v11 = vmul.u32 16, %v161_v7  ;;  %vm146_vm2 = vcmp.ge.s32.totalorder %v127_v5, %v1144_v6  ;;  %vm147_vm6 = vcmp.ge.s32.totalorder %v128_v8, %v1144_v6 }
  0x3d   :  { %vm148_vm9 = vcmp.ge.s32.totalorder %v129_v9, %v1144_v6  ;;  %778 = vmatpush3.bf16.msra.mxu1 %v943_v12  ;;  %vm149_vm14 = vcmp.ge.s32.totalorder %v130_v14, %v1144_v6  ;;  %v133_v23 = vadd.s32 56, %v1138_v3  ;;  %v134_v24 = vadd.s32 64, %v1138_v3  ;;  %v948_v12 = vld [vmem:[#allocation7 + $0x20] sm:$0xff]  }
  0x3e   :  { %vm163_vm3 = vcmp.lt.s32.totalorder %v1138_v3, %v1151_v11  ;;  %vm164_vm4 = vcmp.lt.s32.totalorder %v127_v5, %v1151_v11  ;;  %vm165_vm7 = vcmp.lt.s32.totalorder %v128_v8, %v1151_v11  ;;  %vm166_vm10 = vcmp.lt.s32.totalorder %v129_v9, %v1151_v11  ;;  %883 = vmatprep.subr.bf16.mxu1 %v1061_v2  ;;  %v944_v8 = vld [vmem:[#allocation7] sm:$0xff]   ;;  %v945_v9 = vld [vmem:[#allocation7 + $0x8] sm:$0xff]  }
  0x3f   :  { %vm1159_vm5 = vmand %vm145_vm1, %vm163_vm3  ;;  %vm167_vm15 = vcmp.lt.s32.totalorder %v130_v14, %v1151_v11  ;;  %vm168_vm3 = vcmp.lt.s32.totalorder %v131_v16, %v1151_v11  ;;  %v135_v26 = vadd.s32 72, %v1138_v3  ;;  %v136_v29 = vadd.s32 80, %v1138_v3  ;;  %v950_v14 = vld [vmem:[#allocation7 + $0x30] sm:$0xff]  }
  0x40   :  { %vm1166_vm8 = vmand %vm146_vm2, %vm164_vm4  ;;  %vm150_vm2 = vcmp.ge.s32.totalorder %v131_v16, %v1144_v6  ;;  %780 = vmatmul.mubr.msk.bf16.vlgmr.msra.gmra.mrb[0].mxu1 %vm81_vm12, %v59_v18  ;;  %vm153_vm12 = vcmp.ge.s32.totalorder %v134_v24, %v1144_v6  ;;  %v137_v31 = vadd.s32 88, %v1138_v3  ;;  %v138_v34 = vadd.s32 96, %v1138_v3 }
  0x41   :  { %vm884_vm11 = vmpackc.low %vm1166_vm8, %vm1159_vm5  ;;  %vm152_vm5 = vcmp.ge.s32.totalorder %v133_v23, %v1144_v6  ;;  %vm170_vm8 = vcmp.lt.s32.totalorder %v133_v23, %v1151_v11  ;;  %815 = vmatprep.mubr.msk.f32.mxu1 %vm1060_vm0, %v1059_v0  ;;  %v139_v35 = vadd.s32 104, %v1138_v3  ;;  %v140_v38 = vadd.s32 112, %v1138_v3  ;;  %v554_v23 = vld [vmem:[%s1397_s2 + $0x3] sm:$0x1] }
  0x42   :  { %909 = vmatpush3.bf16.msk.msra.mxu0 %vm884_vm11, %v1062_v19  ;;  %vm1182_vm13 = vmand %vm147_vm6, %vm165_vm7  ;;  %885 = vmatpush3.bf16.msk.msra.mxu1 %vm884_vm11, %v1062_v19  ;;  %v141_v39 = vadd.s32 120, %v1138_v3  ;;  %v375_v47 = vmul.u32 16, %v1138_v3  ;;  %v378_v48 = vadd.s32 1, %v1138_v3  ;;  %v1063_v18 = vmov 1.0  }
  0x43   :  { %vm1190_vm1 = vmand %vm148_vm9, %vm166_vm10  ;;  %910 = vmatprep.subr.bf16.mxu0 %v1061_v2  ;;  %vm151_vm9 = vcmp.ge.s32.totalorder %v132_v21, %v1144_v6  ;;  %vm169_vm10 = vcmp.lt.s32.totalorder %v132_v21, %v1151_v11  ;;  %886 = vmatprep.subr.bf16.mxu1 %v1061_v2 }
  0x44   :  { %vm887_vm4 = vmpackc.low %vm1190_vm1, %vm1182_vm13  ;;  %v376_v49 = vadd.s32 64, %v375_v47  ;;  %v379_v50 = vmul.u32 16, %v378_v48 }
  0x45   :  { %vm1203_vm6 = vmand %vm149_vm14, %vm167_vm15  ;;  %vm171_vm14 = vcmp.lt.s32.totalorder %v134_v24, %v1151_v11 }
  0x46   :  { %912 = vmatpush3.bf16.msk.msra.mxu0 %vm887_vm4, %v1062_v19  ;;  %vm1220_vm7 = vmand %vm150_vm2, %vm168_vm3  ;;  %vm154_vm2 = vcmp.ge.s32.totalorder %v135_v26, %v1144_v6  ;;  %vm172_vm3 = vcmp.lt.s32.totalorder %v135_v26, %v1151_v11  ;;  %888 = vmatpush3.bf16.msk.msra.mxu1 %vm887_vm4, %v1062_v19  ;;  %vm155_vm4 = vcmp.ge.s32.totalorder %v136_v29, %v1144_v6  ;;  %v380_v51 = vadd.s32 64, %v379_v50 }
  0x47   :  { %913 = vmatprep.subr.bf16.mxu0 %v1061_v2  ;;  %vm890_vm11 = vmpackc.low %vm1220_vm7, %vm1203_vm6  ;;  %889 = vmatprep.subr.bf16.mxu1 %v1061_v2 }
  0x48   :  { %vm1238_vm15 = vmand %vm151_vm9, %vm169_vm10 }
  0x49   :  { %vm1257_vm9 = vmand %vm152_vm5, %vm170_vm8  ;;  %vm173_vm5 = vcmp.lt.s32.totalorder %v136_v29, %v1151_v11  ;;  %vm156_vm8 = vcmp.ge.s32.totalorder %v137_v31, %v1144_v6 }
  0x4a   :  { %915 = vmatpush3.bf16.msk.msra.mxu0 %vm890_vm11, %v1062_v19  ;;  %vm1264_vm10 = vmand %vm153_vm12, %vm171_vm14  ;;  %891 = vmatpush3.bf16.msk.msra.mxu1 %vm890_vm11, %v1062_v19  ;;  %vm174_vm12 = vcmp.lt.s32.totalorder %v137_v31, %v1151_v11  ;;  %vm157_vm11 = vcmp.ge.s32.totalorder %v138_v34, %v1144_v6 }
  0x4b   :  { %916 = vmatprep.subr.bf16.mxu0 %v1061_v2  ;;  %vm1268_vm13 = vmand %vm154_vm2, %vm172_vm3  ;;  %892 = vmatprep.subr.bf16.mxu1 %v1061_v2  ;;  %vm158_vm2 = vcmp.ge.s32.totalorder %v139_v35, %v1144_v6  ;;  %vm176_vm3 = vcmp.lt.s32.totalorder %v139_v35, %v1151_v11 }
  0x4c   :  { %vm893_vm1 = vmpackc.low %vm1257_vm9, %vm1238_vm15  ;;  %vm175_vm15 = vcmp.lt.s32.totalorder %v138_v34, %v1151_v11 }
  0x4d   :  { %vm896_vm14 = vmpackc.low %vm1268_vm13, %vm1264_vm10  ;;  %vm159_vm10 = vcmp.ge.s32.totalorder %v140_v38, %v1144_v6  ;;  %vm160_vm13 = vcmp.ge.s32.totalorder %v141_v39, %v1144_v6 }
  0x4e   :  { %918 = vmatpush3.bf16.msk.msra.mxu0 %vm893_vm1, %v1062_v19  ;;  %vm1295_vm6 = vmand %vm155_vm4, %vm173_vm5  ;;  %894 = vmatpush3.bf16.msk.msra.mxu1 %vm893_vm1, %v1062_v19 }
  0x4f   :  { %919 = vmatprep.subr.bf16.mxu0 %v1061_v2  ;;  %vm1299_vm7 = vmand %vm156_vm8, %vm174_vm12  ;;  %895 = vmatprep.subr.bf16.mxu1 %v1061_v2  ;;  %vm177_vm8 = vcmp.lt.s32.totalorder %v140_v38, %v1151_v11  ;;  %vm178_vm12 = vcmp.lt.s32.totalorder %v141_v39, %v1151_v11  ;;  %v947_v11 = vld [vmem:[#allocation7 + $0x18] sm:$0xff]  }
  0x50   :  { %vm899_vm9 = vmpackc.low %vm1299_vm7, %vm1295_vm6 }
  0x51   :  { %vm191_vm1 = vmand %vm157_vm11, %vm175_vm15  ;;  %vm377_vm11 = vcmp.ge.s32.totalorder %v1140_v4, %v376_v49  ;;  %vm381_vm15 = vcmp.lt.s32.totalorder %v1140_v4, %v380_v51 }
  0x52   :  { %921 = vmatpush3.bf16.msk.msra.mxu0 %vm896_vm14, %v1062_v19  ;;  %897 = vmatpush3.bf16.msk.msra.mxu1 %vm896_vm14, %v1062_v19  ;;  %vm192_vm4 = vmand %vm158_vm2, %vm176_vm3  ;;  %vm388_vm2 = vcmask 1043456  }
  0x53   :  { %922 = vmatprep.subr.bf16.mxu0 %v1061_v2  ;;  %898 = vmatprep.subr.bf16.mxu1 %v1061_v2  ;;  %vm902_vm5 = vmpackc.low %vm192_vm4, %vm191_vm1  ;;  %vm384_vm4 = vcmask 31744  }
  0x54   :  { %vm193_vm14 = vmand %vm159_vm10, %vm177_vm8  ;;  %vm657_vm10 = vcmp.lt.s32.totalorder %v1140_v4, 8 }
  0x55   :  { %vm194_vm6 = vmand %vm160_vm13, %vm178_vm12 }
  0x56   :  { %924 = vmatpush3.bf16.msk.msra.mxu0 %vm899_vm9, %v1062_v19  ;;  %900 = vmatpush3.bf16.msk.msra.mxu1 %vm899_vm9, %v1062_v19  ;;  %vm905_vm7 = vmpackc.low %vm194_vm6, %vm193_vm14 }
  0x57   :  { %925 = vmatprep.subr.bf16.mxu0 %v1061_v2  ;;  %901 = vmatprep.subr.bf16.mxu1 %v1061_v2  ;;  %vm382_vm3 = vmand %vm377_vm11, %vm381_vm15 }
  0x58   :  { %v383_v52 = vsel %vm382_vm3, 1.0, %v1059_v0 }
  0x5a   :  { %927 = vmatpush3.bf16.msk.msra.mxu0 %vm902_vm5, %v1062_v19  ;;  %903 = vmatpush3.bf16.msk.msra.mxu1 %vm902_vm5, %v1062_v19 }
  0x5b   :  { %928 = vmatprep.subr.bf16.mxu0 %v1061_v2  ;;  %904 = vmatprep.subr.bf16.mxu1 %v1061_v2  ;;  %v712_v2 = vld [vmem:[%s1397_s2 + $0x1] ss:$0 sm:$0xff]  ;;  %s1064_s2 = smov [#allocation8]  }
  0x5c   :  { %s666_s6 = sshll.u32 %s1064_s2, 4  ;;  %s667_s6 = int_to_ptr.vmem [resolvable:$true] %s666_s6 }
  0x5d   :  { %s1026_s7 = scalar_lea.vmem %s667_s6, 16  ;;  %s1030_s8 = scalar_lea.vmem %s667_s6, 32 }
  0x5e   :  { %906 = vmatpush3.bf16.msk.msra.mxu1 %vm905_vm7, %v1062_v19  ;;  %930 = vmatpush3.bf16.msk.msra.mxu0 %vm905_vm7, %v1062_v19  ;;  %v951_v19 = vld [vmem:[#allocation7 + $0x38] sm:$0xff]   ;;  %p1027_p10 = scmp.ne.s32.totalorder %s667_s6, %s1026_s7  ;;  %p1031_p11 = scmp.lt.s32.totalorder %s667_s6, %s667_s6 }
  0x5f   :  { %853 = vmatprep.subr.mxu1 %v1059_v0  ;;  %863 = vmatprep.subr.bf16.mxu0 %v1059_v0  ;;  %p1032_p12 = scmp.lt.s32.totalorder %s1030_s8, %s1026_s7 }
  0x61   :  { %p1033_p13 = por %p1032_p12, %p1031_p11 }
  0x63   :  { %p1034_p0 = pnand %p1033_p13, %p1027_p10 }
 0x113   :  { %v119_v41 = vpop.f32.mrb[0].mxu1 }
 0x114   :  { %v1348_v42 = vadd.f32 %v676_v40, %v119_v41  ;;  %v781_v43 = vpop.f32.mrb[1].mxu1 }
 0x115   :  { %v122_v44 = vpop.f32.mrb[2].mxu1 }
 0x116   :  { %v782_v45 = vpop.f32.mrb[3].mxu1  ;;  %816 = vmatmul.mubr.f32.vlgmr.msra.gmra.mrb[4].mxu1 %v1348_v42  ;;  %v281_v46 = vmul.f32 %v1348_v42, %v1348_v42 }
 0x117   :  { %855 = vmatprep.mubr.msk.f32.mxu1 %vm1060_vm0, %v1059_v0  ;;  %854 = vmatpush3.msk.msra.mxu1 %vm388_vm2, %v383_v52 }
 0x118   :  { %851 = vmatmul.mubr.f32.vlgmr.msra.gmra.mrb[0].mxu0 %v281_v46  ;;  %858 = vmatprep.subr.mxu1 %v1059_v0 }
 0x119   :  { %879 = vmatprep.mubr.msk.bf16.mxu0 %vm1060_vm0, %v1059_v0  ;;  %864 = vmatpush3.bf16.msra.mxu0 %v944_v8 }
 0x11a   :  { %865 = vmatprep.subr.bf16.mxu0 %v1059_v0 }
 0x11d   :  { %866 = vmatpush3.bf16.msra.mxu0 %v945_v9 }
 0x11e   :  { %867 = vmatprep.subr.bf16.mxu0 %v1059_v0 }
 0x121   :  { %868 = vmatpush3.bf16.msra.mxu0 %v946_v10 }
 0x122   :  { %869 = vmatprep.subr.bf16.mxu0 %v1059_v0 }
 0x125   :  { %870 = vmatpush3.bf16.msra.mxu0 %v947_v11 }
 0x126   :  { %871 = vmatprep.subr.bf16.mxu0 %v1059_v0 }
 0x129   :  { %872 = vmatpush3.bf16.msra.mxu0 %v948_v12 }
 0x12a   :  { %873 = vmatprep.subr.bf16.mxu0 %v1059_v0 }
 0x12d   :  { %874 = vmatpush3.bf16.msra.mxu0 %v949_v13 }
 0x12e   :  { %875 = vmatprep.subr.bf16.mxu0 %v1059_v0 }
 0x131   :  { %876 = vmatpush3.bf16.msra.mxu0 %v950_v14 }
 0x132   :  { %877 = vmatprep.subr.bf16.mxu0 %v1059_v0 }
 0x135   :  { %878 = vmatpush3.bf16.msra.mxu0 %v951_v19 }
 0x1e9   :  { %v277_v53 = vpop.f32.mrb[4].mxu1 }
 0x1ea   :  { %v817_v54 = vpop.f32.mrb[5].mxu1  ;;  %v358_v3 = vmul.f32 %v712_v2, %v277_v53 }
 0x1eb   :  { %v348_v55 = vpop.f32.mrb[0].mxu0 }
 0x1ec   :  { %952 = vrsqrt.f32 %v348_v55  ;;  %v852_v56 = vpop.f32.mrb[1].mxu0  ;;  %vm362_vm9 = vcmp.eq.f32.partialorder %v348_v55, inf  ;;  %v365_v60 = vand.u32 2147483648, %v348_v55  ;;  %vm364_vm1 = vcmp.eq.f32.partialorder %v348_v55, 0.0 }
 0x1ed   :  { %v359_v5 = vmax.f32 %v358_v3, 1e-06 }
 0x1f6   :  { %v953_v57 = vpop.eup %952 }
 0x1f7   :  { %v361_v58 = vmul.f32 %v953_v57, %v348_v55 }
 0x1f9   :  { %v363_v61 = vsel %vm362_vm9, %v348_v55, %v361_v58 }
 0x1fa   :  { %v366_v62 = vsel %vm364_vm1, %v365_v60, %v363_v61 }
 0x1fb   :  { %v371_v63 = vmul.f32 %v713_v59, %v366_v62 }
 0x1fd   :  { %v372_v1 = vmax.f32 %v371_v63, 1e-06 }
 0x1ff   :  { %954 = vrcp.f32 %v372_v1 }
 0x209   :  { %v955_v6 = vpop.eup %954 }
 0x20a   :  { %v374_v7 = vmul.f32 %v955_v6, %v359_v5 }
 0x20c   :  { %856 = vmatmul.mubr.msk.f32.vlgmr.msra.gmra.mrb[6].mxu1 %vm384_vm4, %v374_v7 }
 0x20d   :  { %860 = vmatprep.mubr.msk.f32.mxu1 %vm1060_vm0, %v1059_v0  ;;  %vm463_vm0 = vcmask 64512  }
 0x2df   :  { %v458_v15 = vpop.f32.mrb[6].mxu1 }
 0x2e0   :  { %v462_v16 = vmul.f32 %v458_v15, %v1348_v42  ;;  %v857_v17 = vpop.f32.mrb[7].mxu1 }
 0x2e2   :  { %859 = vmatpush3.msra.mxu1 %v462_v16 }
 0x2e3   :  { %861 = vmatmul.mubr.msk.f32.vlgmr.msra.gmra.mrb[8].mxu1 %vm463_vm0, %v1063_v18 }
 0x3b6   :  { %v533_v20 = vpop.f32.mrb[8].mxu1 }
 0x3b7   :  { %v537_v21 = vpack.c.bf16 %v533_v20, %v533_v20  ;;  %v862_v22 = vpop.f32.mrb[9].mxu1 }
 0x3b9   :  { %880 = vmatmul.mubr.bf16.vlgmr.msra.gmra.mrb[4].mxu0 %v537_v21 }
 0x48c   :  { %v637_v24 = vpop.f32.mrb[4].mxu0 }
 0x48d   :  { %v638_v0 = vadd.f32 %v637_v24, %v554_v23  ;;  %v881_v25 = vpop.f32.mrb[5].mxu0 }
 0x48e   :  { %v640_v26 = vpop.f32.mrb[6].mxu0 }
 0x48f   :  { %v643_v27 = vand.u32 2147483647, %v638_v0  ;;  %v882_v28 = vpop.f32.mrb[7].mxu0 }
 0x491   :  { %v644_v29 = vsub.f32 0.0, %v643_v27 }
 0x493   :  { %v645_v30 = vmul.f32 1.442695, %v644_v29 }
 0x495   :  { %956 = vpow2.f32 %v645_v30 }
 0x49f   :  { %v957_v31 = vpop.eup %956 }
 0x4a0   :  { %v647_v32 = vadd.f32 1.0, %v957_v31  ;;  %v650_v33 = vmul.f32 -0.5, %v957_v31  ;;  %v653_v35 = vand.u32 2147483647, %v957_v31 }
 0x4a2   :  { %958 = vlog2.f32 %v647_v32  ;;  %v651_v34 = vadd.f32 1.0, %v650_v33  ;;  %vm654_vm5 = vcmp.lt.f32.partialorder %v653_v35, 0.0004427343 }
 0x4a4   :  { %v652_v38 = vmul.f32 %v957_v31, %v651_v34 }
 0x4ac   :  { %v959_v36 = vpop.eup %958 }
 0x4ad   :  { %v649_v37 = vmul.f32 0.6931472, %v959_v36 }
 0x4af   :  { %v655_v39 = vsel %vm654_vm5, %v652_v38, %v649_v37 }
 0x4b0   :  { %v656_v40 = vadd.f32 %v655_v39, %v643_v27 }
 0x4b2   :  { %v658_v41 = vsel %vm657_vm10, %v638_v0, %v656_v40 }
 0x4b3   :  { %659 = vst [vmem:[#allocation8] sm:$0x1] %v658_v41 }
 0x4b4   :  { %1037 = shalt.err (!%p1034_p0)
}
 0x4b5   :  { %s1038_s11 = scalar_lea.hbm %s1399_s4, 16 }
 0x4b6   :  { %p1039_p1 = scmp.ne.s32.totalorder %s1399_s4, %s1038_s11  ;;  %p1042_p2 = scmp.lt.u32.totalorder %s1038_s11, %s1399_s4 }
 0x4b8   :  { %p1044_p3 = pnand %p1042_p2, %p1039_p1 }
 0x4ba   :  { %1047 = shalt.err (!%p1044_p3)
}
 0x4bb   :  { %669 = dma.vmem_to_hbm [thread:$0]  %s667_s6, 16, %s1399_s4, [#allocation4]  }
 0x4bc   :  { %1052 = dma.done.wait [#allocation4], 16  }
 0x4bd   :  { %1053 = vsyncadd [#allocation4], 4294967280 }
 0x4be   :  { %673 = vsyncpa [#allocation3], 1 }
 0x4bf   :  { %674 = vsyncpa [#allocation6], 1 }
 0x4c0   :  { %675 = vsyncpa [#allocation4], 1 }

</bundles_post_ra>
